<compile_context>
chip_gen: v6e
topology: v6e:2x2x1
jax: 0.10.0
libtpu: 0.0.40
codegen_flags: <defaults>
</compile_context>

<pallas_src>
import functools

import jax
import jax.numpy as jnp
from jax.experimental import pallas as pl
from jax.experimental.pallas import tpu as pltpu


# ---------------------------------------------------------------------------
# Kernel: fused InstanceNorm2d statistics + affine modulation
# ---------------------------------------------------------------------------
def _adain_kernel(x_ref, gamma_ref, beta_ref, o_ref, *, eps, inv_hw):
    """One row-tile block.

    x_ref     : (TR, HW) activation tile (rows = flattened (n, c) pairs)
    gamma_ref : (TR, 1)  per-row gamma (already projected in the wrapper)
    beta_ref  : (TR, 1)  per-row beta
    o_ref     : (TR, HW) output tile
    """
    xf = x_ref[...].astype(jnp.float32)                       # (TR, HW)

    # One-pass statistics: sum and sum-of-squares (f32 accumulation).
    s1 = jnp.sum(xf, axis=-1, keepdims=True)                  # (TR, 1)
    s2 = jnp.sum(xf * xf, axis=-1, keepdims=True)             # (TR, 1)
    mean = s1 * inv_hw
    var = jnp.maximum(s2 * inv_hw - mean * mean, 0.0)         # clamp cancellation

    # Fold normalization + modulation into per-row scale / shift scalars,
    # then a single full-tile elementwise pass.
    scale = gamma_ref[...].astype(jnp.float32) * jax.lax.rsqrt(var + eps)  # (TR, 1)
    shift = beta_ref[...].astype(jnp.float32) - scale * mean               # (TR, 1)

    o_ref[...] = (xf * scale + shift).astype(o_ref.dtype)


# ---------------------------------------------------------------------------
# Glue: spectral norm (tiny per-weight preprocessing, plain JAX)
# ---------------------------------------------------------------------------
def _spectral_sigma(weight, n_iter=20, eps=1e-12):
    """Largest singular value via power iteration (torch spectral_norm semantics)."""
    out_dim, _ = weight.shape
    u0 = jnp.full((out_dim,), out_dim ** -0.5, weight.dtype)

    def body(_, u):
        v = weight.T @ u
        v = v / (jnp.linalg.norm(v) + eps)
        u = weight @ v
        u = u / (jnp.linalg.norm(u) + eps)
        return u

    u = jax.lax.fori_loop(0, n_iter, body, u0)
    v = weight.T @ u
    v = v / (jnp.linalg.norm(v) + eps)
    return jnp.dot(u, weight @ v)


def _pick_row_tile(num_rows, hw, dtype, budget_bytes=4 * 1024 * 1024):
    """Largest 8-aligned divisor of num_rows whose x-block fits the VMEM budget."""
    itemsize = jnp.dtype(dtype).itemsize
    max_rows = max(8, budget_bytes // max(1, hw * itemsize))
    if num_rows <= max_rows:
        return num_rows                       # full extent block: always legal
    for d in range(min(num_rows, max_rows), 7, -1):
        if num_rows % d == 0 and d % 8 == 0:
            return d
    # TODO(synk): no 8-aligned row divisor fits the budget (e.g. huge H*W with
    # odd row counts); a spatially-tiled two-pass stats reduction would be
    # needed.  Fall back to the full row extent.
    return num_rows


def adain(x, w, gamma_weight, gamma_bias, beta_weight, beta_bias,
          *, w_mul=1.0, b_mul=1.0, eps=1e-5):
    """AdaIN forward.  x: (N, C, H, W) NCHW activations;  w: (N, D) latents."""
    N, C, H, W = x.shape
    Nw, D = w.shape
    assert Nw == N
    HW = H * W
    R = N * C

    # ---- glue: spectral norm + equal-lr scaling (per-weight, tiny) ----
    wg = (gamma_weight / _spectral_sigma(gamma_weight)) * w_mul          # (C, D)
    wb = (beta_weight / _spectral_sigma(beta_weight)) * w_mul            # (C, D)

    # ---- hoisted gamma/beta projection (tiny XLA matmul, f32) ----
    wf = w.astype(jnp.float32)
    gamma = wf @ wg.astype(jnp.float32).T + (gamma_bias * b_mul).astype(jnp.float32)
    beta = wf @ wb.astype(jnp.float32).T + (beta_bias * b_mul).astype(jnp.float32)
    gamma2 = gamma.reshape(R, 1)                                          # (N*C, 1)
    beta2 = beta.reshape(R, 1)

    x2 = x.reshape(R, HW)                      # lane-dense last dim = H*W

    tr = _pick_row_tile(R, HW, x.dtype)
    grid = (R // tr,)

    out = pl.pallas_call(
        functools.partial(_adain_kernel, eps=eps, inv_hw=1.0 / HW),
        out_shape=jax.ShapeDtypeStruct((R, HW), x.dtype),
        grid=grid,
        in_specs=[
            pl.BlockSpec((tr, HW), lambda r: (r, 0)),   # x rows
            pl.BlockSpec((tr, 1), lambda r: (r, 0)),    # gamma per row
            pl.BlockSpec((tr, 1), lambda r: (r, 0)),    # beta per row
        ],
        out_specs=pl.BlockSpec((tr, HW), lambda r: (r, 0)),
        compiler_params=pltpu.CompilerParams(
            dimension_semantics=("parallel",),
            vmem_limit_bytes=64 * 1024 * 1024),
    )(x2, gamma2, beta2)

    return out.reshape(N, C, H, W)


if __name__ == "__main__":
    # AdaIN(output_size=channels, input_size=latent_dim); x: (N,C,H,W), w: (N,D)
    batch, channels, latent_dim = 2, 4, 32
    H = W = 16
    gain, lrmul = 2 ** 0.5, 1.0

    key = jax.random.PRNGKey(0)
    kx, kw, kg, kb = jax.random.split(key, 4)
    x = jax.random.normal(kx, (batch, channels, H, W), dtype=jnp.float32)
    w = jax.random.normal(kw, (batch, latent_dim), dtype=jnp.float32)

    # CustomLinear init: weight = randn(out, in) * (he_std / lrmul), bias = 0
    he_std = gain * latent_dim ** (-0.5)
    init_std = he_std / lrmul
    gamma_weight = jax.random.normal(kg, (channels, latent_dim), jnp.float32) * init_std
    beta_weight = jax.random.normal(kb, (channels, latent_dim), jnp.float32) * init_std
    gamma_bias = jnp.zeros((channels,), jnp.float32)
    beta_bias = jnp.zeros((channels,), jnp.float32)

    y = adain(x, w, gamma_weight, gamma_bias, beta_weight, beta_bias,
              w_mul=lrmul, b_mul=lrmul)
    y = jax.block_until_ready(y)

    # ---- pure-JAX reference (same semantics as the PyTorch module) ----
    wg_eff = (gamma_weight / _spectral_sigma(gamma_weight)) * lrmul
    wb_eff = (beta_weight / _spectral_sigma(beta_weight)) * lrmul
    gamma_ref = w @ wg_eff.T + gamma_bias * lrmul                 # (N, C)
    beta_ref = w @ wb_eff.T + beta_bias * lrmul                   # (N, C)
    mean = x.mean(axis=(2, 3), keepdims=True)
    var = x.var(axis=(2, 3), keepdims=True)                       # biased, like InstanceNorm2d
    x_norm = (x - mean) / jnp.sqrt(var + 1e-5)
    y_ref = gamma_ref[:, :, None, None] * x_norm + beta_ref[:, :, None, None]

    assert y.shape == (batch, channels, H, W)
    assert jnp.allclose(y, y_ref, atol=1e-4, rtol=1e-4), \
        float(jnp.max(jnp.abs(y - y_ref)))

    print("KERNEL_OK")
</pallas_src>

<mosaic_0001>
module attributes {stable_mosaic.version = 11 : i64} {
  func.func @_adain_kernel(%arg0: i32, %arg1: memref<8x256xf32, #tpu.memory_space<vmem>>, %arg2: memref<8x1xf32, #tpu.memory_space<vmem>>, %arg3: memref<8x1xf32, #tpu.memory_space<vmem>>, %arg4: memref<8x256xf32, #tpu.memory_space<vmem>>) attributes {dimension_semantics = [#tpu.dimension_semantics<parallel>], iteration_bounds = array<i64: 1>, scalar_prefetch = 0 : i64, scratch_operands = 0 : i64, tpu.core_type = #tpu.core_type<tc>, window_params = [{transform_indices = @transform_0, window_bounds = array<i64: 8, 256>}, {transform_indices = @transform_1, window_bounds = array<i64: 8, 1>}, {transform_indices = @transform_2, window_bounds = array<i64: 8, 1>}, {transform_indices = @transform_3, window_bounds = array<i64: 8, 256>}]} {
    %c0 = arith.constant 0 : index
    %c0_0 = arith.constant 0 : index
    %0 = vector.load %arg1[%c0, %c0_0] : memref<8x256xf32, #tpu.memory_space<vmem>>, vector<8x256xf32>
    %cst = arith.constant dense<0.000000e+00> : vector<8xf32>
    %1 = vector.multi_reduction <add>, %0, %cst [1] : vector<8x256xf32> to vector<8xf32>
    %2 = vector.shape_cast %1 : vector<8xf32> to vector<8x1xf32>
    %3 = arith.mulf %0, %0 : vector<8x256xf32>
    %cst_1 = arith.constant dense<0.000000e+00> : vector<8xf32>
    %4 = vector.multi_reduction <add>, %3, %cst_1 [1] : vector<8x256xf32> to vector<8xf32>
    %5 = vector.shape_cast %4 : vector<8xf32> to vector<8x1xf32>
    %cst_2 = arith.constant 3.906250e-03 : f32
    %6 = vector.broadcast %cst_2 : f32 to vector<8x1xf32>
    %7 = arith.mulf %2, %6 : vector<8x1xf32>
    %cst_3 = arith.constant 3.906250e-03 : f32
    %8 = vector.broadcast %cst_3 : f32 to vector<8x1xf32>
    %9 = arith.mulf %5, %8 : vector<8x1xf32>
    %10 = arith.mulf %7, %7 : vector<8x1xf32>
    %11 = arith.subf %9, %10 : vector<8x1xf32>
    %cst_4 = arith.constant 0.000000e+00 : f32
    %12 = vector.broadcast %cst_4 : f32 to vector<8x1xf32>
    %13 = arith.maximumf %11, %12 : vector<8x1xf32>
    %c0_5 = arith.constant 0 : index
    %c0_6 = arith.constant 0 : index
    %14 = vector.load %arg2[%c0_5, %c0_6] : memref<8x1xf32, #tpu.memory_space<vmem>>, vector<8x1xf32>
    %cst_7 = arith.constant 9.99999974E-6 : f32
    %15 = vector.broadcast %cst_7 : f32 to vector<8x1xf32>
    %16 = arith.addf %13, %15 : vector<8x1xf32>
    %17 = math.rsqrt %16 : vector<8x1xf32>
    %18 = arith.mulf %14, %17 : vector<8x1xf32>
    %c0_8 = arith.constant 0 : index
    %c0_9 = arith.constant 0 : index
    %19 = vector.load %arg3[%c0_8, %c0_9] : memref<8x1xf32, #tpu.memory_space<vmem>>, vector<8x1xf32>
    %20 = arith.mulf %18, %7 : vector<8x1xf32>
    %21 = arith.subf %19, %20 : vector<8x1xf32>
    %22 = vector.broadcast %18 : vector<8x1xf32> to vector<8x256xf32>
    %23 = arith.mulf %0, %22 : vector<8x256xf32>
    %24 = vector.broadcast %21 : vector<8x1xf32> to vector<8x256xf32>
    %25 = arith.addf %23, %24 : vector<8x256xf32>
    %c0_10 = arith.constant 0 : index
    %c0_11 = arith.constant 0 : index
    %26 = vector.load %arg4[%c0_10, %c0_11] : memref<8x256xf32, #tpu.memory_space<vmem>>, vector<8x256xf32>
    tpu.vector_store %arg4[%c0_10, %c0_11], %25 {strides = array<i32>} : memref<8x256xf32, #tpu.memory_space<vmem>>, vector<8x256xf32>,
    return
  }
  func.func @transform_0(%arg0: i32) -> (i32, i32) {
    %c0_i32 = arith.constant 0 : i32
    %c0_i32_0 = arith.constant 0 : i32
    return %arg0, %c0_i32 : i32, i32
  }
  func.func @transform_1(%arg0: i32) -> (i32, i32) {
    %c0_i32 = arith.constant 0 : i32
    %c0_i32_0 = arith.constant 0 : i32
    return %arg0, %c0_i32 : i32, i32
  }
  func.func @transform_2(%arg0: i32) -> (i32, i32) {
    %c0_i32 = arith.constant 0 : i32
    %c0_i32_0 = arith.constant 0 : i32
    return %arg0, %c0_i32 : i32, i32
  }
  func.func @transform_3(%arg0: i32) -> (i32, i32) {
    %c0_i32 = arith.constant 0 : i32
    %c0_i32_0 = arith.constant 0 : i32
    return %arg0, %c0_i32 : i32, i32
  }
}

</mosaic_0001>

<bundles_post_ra>
// kernel: tpu_custom_call.1
= control target key start
LH: loop header
LB: loop body
LE: loop exit
PB: predicated region body
PF: predicated region fallthrough
CT: control target
= control target key end

     0   :  { %s132_s0 = inlined_call_operand.vmem [shape: f32[8,256], index: 0, kind: input, shape index: {}]   ;;  %s133_s1 = inlined_call_operand.vmem [shape: f32[8,1], index: 1, kind: input, shape index: {}]   ;;  %s134_s2 = inlined_call_operand.vmem [shape: f32[8,1], index: 2, kind: input, shape index: {}]   ;;  %s135_s3 = inlined_call_operand.hbm [shape: f32[8,256], index: 3, kind: output, shape index: {}]  }
   0x1   :  { %v15_v0 = vld [vmem:[%s132_s0] sm:$0xff]  ;;  %v16_v1 = vld [vmem:[%s132_s0 + $0x8] sm:$0xff] }
   0x2   :  { %8 = vsyncpa [#allocation3], 0  ;;  %v17_v2 = vadd.f32 %v16_v1, %v15_v0  ;;  %v20_v3 = vmul.f32 %v15_v0, %v15_v0  ;;  %v21_v4 = vmul.f32 %v16_v1, %v16_v1  ;;  %v95_v6 = vmov 0   ;;  %v30_v15 = vld [vmem:[%s133_s1] sm:$0xff]  ;;  %s96_s19 = smov [#allocation2]  }
   0x3   :  { %69 = vset.pattern.permute.xlu1 %v95_v6  ;;  %70 = vset.pattern.permute.xlu0 %v95_v6  ;;  %v34_v18 = vld [vmem:[%s134_s2] sm:$0xff]  ;;  %s59_s20 = sshll.u32 %s96_s19, 4  ;;  %s60_s20 = int_to_ptr.vmem [resolvable:$true] %s59_s20 }
   0x4   :  { %18 = vadd.xlane.f32.xlu0 %v17_v2  ;;  %v22_v5 = vadd.f32 %v21_v4, %v20_v3  ;;  %s73_s1 = scalar_lea.vmem %s60_s20, 256  ;;  %p78_p1 = scmp.lt.s32.totalorder %s60_s20, %s60_s20 }
   0x5   :  { %p74_p0 = scmp.ne.s32.totalorder %s60_s20, %s73_s1  ;;  %p79_p2 = scmp.lt.s32.totalorder %s73_s1, %s73_s1 }
   0x7   :  { %p80_p3 = por %p79_p2, %p78_p1 }
   0x8   :  { %23 = vadd.xlane.f32.xlu0 %v22_v5 }
   0x9   :  { %p81_p4 = pnand %p80_p3, %p74_p0 }
  0x8d   :  { %v19_v7 = vpop.xlane.xlu0 %18 }
  0x8e   :  { %v25_v8 = vmul.f32 0.00390625, %v19_v7 }
  0x90   :  { %v27_v10 = vmul.f32 %v25_v8, %v25_v8 }
  0x91   :  { %v24_v9 = vpop.xlane.xlu0 %23 }
  0x92   :  { %v26_v11 = vmul.f32 0.00390625, %v24_v9 }
  0x94   :  { %v28_v12 = vsub.f32 %v26_v11, %v27_v10 }
  0x96   :  { %v29_v13 = vmax.f32 %v28_v12, 0.0 }
  0x98   :  { %v31_v14 = vadd.f32 1e-05, %v29_v13 }
  0x9a   :  { %71 = vrsqrt.f32 %v31_v14 }
  0xa7   :  { %v72_v16 = vpop.eup %71 }
  0xa8   :  { %v33_v17 = vmul.f32 %v72_v16, %v30_v15 }
  0xaa   :  { %39 = vperm.xlu1 %69, %v33_v17   ;;  %v35_v19 = vmul.f32 %v33_v17, %v25_v8 }
  0xac   :  { %v36_v20 = vsub.f32 %v34_v18, %v35_v19 }
  0xae   :  { %46 = vperm.xlu1 %69, %v36_v20  }
 0x125   :  { %v40_v21 = vpop.permute.xlu1 %39 }
 0x126   :  { %v42_v22 = vmul.f32 %v40_v21, %v15_v0  ;;  %v43_v23 = vmul.f32 %v40_v21, %v16_v1 }
 0x129   :  { %v47_v24 = vpop.permute.xlu1 %46 }
 0x12a   :  { %v49_v25 = vadd.f32 %v47_v24, %v42_v22  ;;  %v50_v26 = vadd.f32 %v47_v24, %v43_v23 }
 0x12c   :  { %51 = vst [vmem:[#allocation2] sm:$0xff] %v49_v25  ;;  %52 = vst [vmem:[#allocation2 + $0x8] sm:$0xff] %v50_v26 }
 0x12d   :  { %84 = shalt.err (!%p81_p4)
}
 0x12e   :  { %62 = dma.vmem_to_hbm [thread:$0]  %s60_s20, 256, %s135_s3, [#allocation3]  }
 0x12f   :  { %93 = dma.done.wait [#allocation3], 256  }
 0x130   :  { %94 = vsyncadd [#allocation3], 4294967040 }
 0x131   :  { %66 = vsyncpa [#allocation3], 1 }

</bundles_post_ra>
